<compile_context>
chip_gen: v5e
topology: v5e:2x2
jax: 0.10.0
libtpu: 0.0.40
codegen_flags: <defaults>
</compile_context>

<pallas_src>
import functools

import jax
import jax.numpy as jnp
from jax import lax
from jax.experimental import pallas as pl
from jax.experimental.pallas import tpu as pltpu


def _pick_row_tile(n):
    """Largest MXU/sublane-friendly query-row tile that evenly divides n."""
    for tq in (512, 256, 128):
        if n > tq and n % tq == 0:
            return tq
    return n


def _post_cross_attn_kernel(q_ref, k_ref, v_ref, m_ref,
                            wq_ref, wk_ref, wv_ref, o_ref,
                            kp_scr, vp_scr,
                            *, scale, num_heads, dq, dv):
    # Block shapes (grid point (b, t)):
    #   q_ref: (1, TQ, C)   k_ref: (1, N, C)   v_ref: (1, N, C_v)
    #   m_ref: (1, TQ, N)   wq/wk: (C, C)      wv: (C_v, C_v)
    #   o_ref: (1, TQ, C_v) kp_scr: (N, C) bf16  vp_scr: (N, C_v) bf16
    t = pl.program_id(1)

    # ---- K'/V' projections: full width, once per batch, cached in VMEM. ----
    @pl.when(t == 0)
    def _():
        k_in = k_ref[0].astype(jnp.bfloat16)
        v_in = v_ref[0].astype(jnp.bfloat16)
        kp_scr[...] = jnp.dot(k_in, wk_ref[...].astype(jnp.bfloat16),
                              preferred_element_type=jnp.float32
                              ).astype(jnp.bfloat16)
        vp_scr[...] = jnp.dot(v_in, wv_ref[...].astype(jnp.bfloat16),
                              preferred_element_type=jnp.float32
                              ).astype(jnp.bfloat16)

    # ---- Q projection for this row tile: one wide (TQ, C)@(C, C) MXU pass. --
    q_in = q_ref[0].astype(jnp.bfloat16)
    qp = (jnp.dot(q_in, wq_ref[...].astype(jnp.bfloat16),
                  preferred_element_type=jnp.float32) * scale
          ).astype(jnp.bfloat16)                                  # (TQ, C)

    # ---- Mask renormalization computed once per tile (shared by all heads). -
    mask = m_ref[0].astype(jnp.float32)                           # (TQ, N)
    hms = num_heads * jnp.sum(mask, axis=-1, keepdims=True)       # (TQ, 1)
    # eps guard: all-zero mask rows -> output 0 instead of NaN.
    mask_scaled = mask * pl.reciprocal(jnp.maximum(hms, 1e-30), approx=True)

    kp = kp_scr[...]                                              # (N, C)   bf16
    vp = vp_scr[...]                                              # (N, C_v) bf16

    outs = []
    for h in range(num_heads):                                    # static unroll
        qh = qp[:, h * dq:(h + 1) * dq]                           # (TQ, Dq) bf16
        kh = kp[:, h * dq:(h + 1) * dq]                           # (N,  Dq) bf16
        vh = vp[:, h * dv:(h + 1) * dv]                           # (N,  Dv) bf16

        s = lax.dot_general(qh, kh, (((1,), (1,)), ((), ())),
                            preferred_element_type=jnp.float32)   # (TQ, N) f32
        s = s - jnp.max(s, axis=-1, keepdims=True)
        e = jnp.exp(s)
        sum_e = jnp.sum(e, axis=-1, keepdims=True)                # (TQ, 1)

        # softmax * mask / (H * mask_sum) folded as:
        #   ((e * mask_scaled) @ v_h) * 1/sum_e
        # (divides -> EUP reciprocal; the 1/sum_e scaling hits the narrow
        #  (TQ, Dv) result instead of the (TQ, N) prob tile)
        p = (e * mask_scaled).astype(jnp.bfloat16)
        o_h = jnp.dot(p, vh, preferred_element_type=jnp.float32)  # (TQ, Dv)
        o_h = o_h * pl.reciprocal(sum_e, approx=True)
        outs.append(o_h)

    # One lane-dense (TQ, C_v) store; heads concatenated in-register.
    o_ref[0] = jnp.concatenate(outs, axis=-1).astype(o_ref.dtype)


def post_cross_attention(q, k, v, masks, wq, wk, wv, *, num_heads, dim):
    """q,k: (B, N, 3*dim)  v: (B, N, 2*dim)  masks: (B, N, N) (any dtype).

    wq, wk: (3*dim, 3*dim), wv: (2*dim, 2*dim), stored (in, out) so the math is
    x @ W (equivalent to torch's x @ W_torch.T). Returns (B, N, 2*dim).
    """
    B, N, C = q.shape
    _, _, C_v = v.shape
    H = num_heads
    Dq = C // H
    Dv = C_v // H
    scale = float((dim // H) ** -0.5)

    TQ = _pick_row_tile(N)
    n_row_tiles = N // TQ

    # bf16 MXU operands; cast weights once wrapper-side (halves weight HBM traffic).
    wq = wq.astype(jnp.bfloat16)
    wk = wk.astype(jnp.bfloat16)
    wv = wv.astype(jnp.bfloat16)

    kernel = functools.partial(_post_cross_attn_kernel, scale=scale,
                               num_heads=H, dq=Dq, dv=Dv)

    # Advisory cost model (weights read once, activations once, output written once).
    flops = (2 * B * N * (C * C + C * C + C_v * C_v)       # projections
             + 2 * B * N * N * (C + C_v))                  # scores + attn@V (all heads)
    bytes_accessed = ((q.size + k.size) * q.dtype.itemsize
                      + v.size * v.dtype.itemsize
                      + masks.size * masks.dtype.itemsize
                      + (wq.size + wk.size + wv.size) * wq.dtype.itemsize
                      + B * N * C_v * q.dtype.itemsize)

    # VMEM budget derived from the actual blocks (v7x has only 64 MiB per TC).
    vmem_need = (
        2 * (TQ * C * q.dtype.itemsize            # q tile (double-buffered)
             + N * C * k.dtype.itemsize           # k
             + N * C_v * v.dtype.itemsize         # v
             + TQ * N * masks.dtype.itemsize)     # mask tile
        + 2 * TQ * C_v * q.dtype.itemsize         # output tile
        + 2 * (2 * C * C + C_v * C_v) * wq.dtype.itemsize   # weights (resident)
        + (N * C + N * C_v) * 2                   # bf16 K'/V' scratch
    )
    vmem_limit = int(min(max(vmem_need * 5 // 4 + (4 << 20), 32 << 20), 100 << 20))

    return pl.pallas_call(
        kernel,
        out_shape=jax.ShapeDtypeStruct((B, N, C_v), q.dtype),
        grid_spec=pltpu.PrefetchScalarGridSpec(
            num_scalar_prefetch=0,
            grid=(B, n_row_tiles),                 # row tiles innermost: K'/V' reused
            in_specs=[
                pl.BlockSpec((1, TQ, C), lambda b, t: (b, t, 0)),    # q rows
                pl.BlockSpec((1, N, C), lambda b, t: (b, 0, 0)),     # k (resident per b)
                pl.BlockSpec((1, N, C_v), lambda b, t: (b, 0, 0)),   # v (resident per b)
                pl.BlockSpec((1, TQ, N), lambda b, t: (b, t, 0)),    # mask rows
                pl.BlockSpec((C, C), lambda b, t: (0, 0)),           # Wq (fetched once)
                pl.BlockSpec((C, C), lambda b, t: (0, 0)),           # Wk
                pl.BlockSpec((C_v, C_v), lambda b, t: (0, 0)),       # Wv
            ],
            out_specs=pl.BlockSpec((1, TQ, C_v), lambda b, t: (b, t, 0)),
            scratch_shapes=[
                pltpu.VMEM((N, C), jnp.bfloat16),      # K' cache
                pltpu.VMEM((N, C_v), jnp.bfloat16),    # V' cache
            ],
        ),
        compiler_params=pltpu.CompilerParams(
            # Row-tile axis carries K'/V' scratch across iterations -> arbitrary.
            dimension_semantics=("parallel", "arbitrary"),
            vmem_limit_bytes=vmem_limit,
        ),
        cost_estimate=pl.CostEstimate(
            flops=int(flops),
            transcendentals=int(B * H * N * N),
            bytes_accessed=int(bytes_accessed),
        ),
    )(q, k, v, masks, wq, wk, wv)


def init_post_cross_attention_params(key, dim, dtype=jnp.float32):
    """nn.Linear(bias=False) default init: U(-1/sqrt(fan_in), +1/sqrt(fan_in))."""
    C, C_v = 3 * dim, 2 * dim
    k1, k2, k3 = jax.random.split(key, 3)
    b_qk = 1.0 / (C ** 0.5)
    b_v = 1.0 / (C_v ** 0.5)
    # Stored (in, out); torch keeps (out, in) and applies x @ W.T -- same math.
    wq = jax.random.uniform(k1, (C, C), dtype, -b_qk, b_qk)
    wk = jax.random.uniform(k2, (C, C), dtype, -b_qk, b_qk)
    wv = jax.random.uniform(k3, (C_v, C_v), dtype, -b_v, b_v)
    return wq, wk, wv


def _reference(q, k, v, masks, wq, wk, wv, *, num_heads, dim):
    """Pure-JAX f32 transcription of the PyTorch forward (correctness check)."""
    B, N, C = q.shape
    _, _, C_v = v.shape
    H = num_heads
    scale = (dim // H) ** -0.5
    qp = (q @ wq).reshape(B, N, H, C // H).transpose(0, 2, 1, 3)
    kp = (k @ wk).reshape(B, N, H, C // H).transpose(0, 2, 1, 3)
    vp = (v @ wv).reshape(B, N, H, C_v // H).transpose(0, 2, 1, 3)
    attn = jnp.einsum("bhnd,bhmd->bhnm", qp, kp) * scale
    attn = jax.nn.softmax(attn, axis=-1)
    m = masks[:, None, :, :]
    attn = attn * m / (H * jnp.sum(m, axis=-1, keepdims=True))
    x = jnp.einsum("bhnm,bhmd->bhnd", attn, vp)
    return x.transpose(0, 2, 1, 3).reshape(B, N, C_v)


if __name__ == "__main__":
    key = jax.random.PRNGKey(0)
    key_q, key_k, key_v, key_m, key_p = jax.random.split(key, 5)

    B, N, dim, nhead = 2, 8, 32, 4
    C, C_v = 3 * dim, 2 * dim

    q = jax.random.normal(key_q, (B, N, C), jnp.float32)
    k = jax.random.normal(key_k, (B, N, C), jnp.float32)
    v = jax.random.normal(key_v, (B, N, C_v), jnp.float32)

    # Binary attention mask with non-zero row sums (matches the torch module's
    # assumption; the kernel itself also guards all-zero rows).
    masks = (jax.random.uniform(key_m, (B, N, N)) > 0.3).astype(jnp.float32)
    masks = jnp.maximum(masks, jnp.eye(N, dtype=jnp.float32)[None])

    wq, wk, wv = init_post_cross_attention_params(key_p, dim)

    # Mask passed in bf16 (exact for 0/1 values) to cut its HBM traffic in half.
    out = post_cross_attention(q, k, v, masks.astype(jnp.bfloat16), wq, wk, wv,
                               num_heads=nhead, dim=dim)
    out = jax.block_until_ready(out)

    ref = _reference(q, k, v, masks, wq, wk, wv, num_heads=nhead, dim=dim)
    assert out.shape == (B, N, C_v)
    max_err = float(jnp.max(jnp.abs(out - ref)))
    assert jnp.isfinite(max_err), max_err
    # bf16 MXU operands with f32 accumulation -> relaxed (but tight) tolerance.
    assert jnp.allclose(out, ref, atol=1e-2, rtol=1e-2), max_err

    print("KERNEL_OK")
</pallas_src>

<mosaic_0001>
module attributes {stable_mosaic.version = 11 : i64} {
  func.func @_post_cross_attn_kernel(%arg0: i32, %arg1: i32, %arg2: memref<1x8x96xf32, #tpu.memory_space<vmem>>, %arg3: memref<1x8x96xf32, #tpu.memory_space<vmem>>, %arg4: memref<1x8x64xf32, #tpu.memory_space<vmem>>, %arg5: memref<1x8x8xbf16, #tpu.memory_space<vmem>>, %arg6: memref<96x96xbf16, #tpu.memory_space<vmem>>, %arg7: memref<96x96xbf16, #tpu.memory_space<vmem>>, %arg8: memref<64x64xbf16, #tpu.memory_space<vmem>>, %arg9: memref<1x8x64xf32, #tpu.memory_space<vmem>>, %arg10: memref<8x96xbf16, #tpu.memory_space<vmem>>, %arg11: memref<8x64xbf16, #tpu.memory_space<vmem>>) attributes {dimension_semantics = [#tpu.dimension_semantics<parallel>, #tpu.dimension_semantics<arbitrary>], iteration_bounds = array<i64: 2, 1>, scalar_prefetch = 0 : i64, scratch_operands = 2 : i64, tpu.core_type = #tpu.core_type<tc>, window_params = [{transform_indices = @transform_0, window_bounds = array<i64: 1, 8, 96>}, {transform_indices = @transform_1, window_bounds = array<i64: 1, 8, 96>}, {transform_indices = @transform_2, window_bounds = array<i64: 1, 8, 64>}, {transform_indices = @transform_3, window_bounds = array<i64: 1, 8, 8>}, {pipeline_mode = #tpu.pipeline_mode<synchronous>, transform_indices = @transform_4, window_bounds = array<i64: 96, 96>}, {pipeline_mode = #tpu.pipeline_mode<synchronous>, transform_indices = @transform_5, window_bounds = array<i64: 96, 96>}, {pipeline_mode = #tpu.pipeline_mode<synchronous>, transform_indices = @transform_6, window_bounds = array<i64: 64, 64>}, {transform_indices = @transform_7, window_bounds = array<i64: 1, 8, 64>}]} {
    %c0_i32 = arith.constant 0 : i32
    %0 = arith.cmpi eq, %arg1, %c0_i32 : i32
    %1 = arith.extui %0 : i1 to i32
    %c0_i32_0 = arith.constant 0 : i32
    %2 = arith.cmpi ne, %1, %c0_i32_0 : i32
    scf.if %2 {
      %c0_35 = arith.constant 0 : index
      %c0_36 = arith.constant 0 : index
      %c0_37 = arith.constant 0 : index
      %97 = vector.load %arg3[%c0_35, %c0_36, %c0_37] : memref<1x8x96xf32, #tpu.memory_space<vmem>>, vector<1x8x96xf32>
      %98 = vector.shape_cast %97 : vector<1x8x96xf32> to vector<8x96xf32>
      %99 = arith.truncf %98 : vector<8x96xf32> to vector<8x96xbf16>
      %c0_38 = arith.constant 0 : index
      %c0_39 = arith.constant 0 : index
      %c0_40 = arith.constant 0 : index
      %100 = vector.load %arg4[%c0_38, %c0_39, %c0_40] : memref<1x8x64xf32, #tpu.memory_space<vmem>>, vector<1x8x64xf32>
      %101 = vector.shape_cast %100 : vector<1x8x64xf32> to vector<8x64xf32>
      %102 = arith.truncf %101 : vector<8x64xf32> to vector<8x64xbf16>
      %c0_41 = arith.constant 0 : index
      %c0_42 = arith.constant 0 : index
      %103 = vector.load %arg7[%c0_41, %c0_42] : memref<96x96xbf16, #tpu.memory_space<vmem>>, vector<96x96xbf16>
      %cst_43 = arith.constant dense<0.000000e+00> : vector<8x96xf32>
      %104 = tpu.matmul %99, %103, %cst_43 {dimension_numbers = #tpu.dot_dimension_numbers<[1], [0], [0], [1], [0, 0, 1, 1], [], []>} : vector<8x96xbf16>, vector<96x96xbf16>, vector<8x96xf32> -> vector<8x96xf32>
      %105 = arith.truncf %104 : vector<8x96xf32> to vector<8x96xbf16>
      %c0_44 = arith.constant 0 : index
      %c0_45 = arith.constant 0 : index
      %106 = vector.load %arg10[%c0_44, %c0_45] : memref<8x96xbf16, #tpu.memory_space<vmem>>, vector<8x96xbf16>
      tpu.vector_store %arg10[%c0_44, %c0_45], %105 {strides = array<i32>} : memref<8x96xbf16, #tpu.memory_space<vmem>>, vector<8x96xbf16>,
      %c0_46 = arith.constant 0 : index
      %c0_47 = arith.constant 0 : index
      %107 = vector.load %arg8[%c0_46, %c0_47] : memref<64x64xbf16, #tpu.memory_space<vmem>>, vector<64x64xbf16>
      %cst_48 = arith.constant dense<0.000000e+00> : vector<8x64xf32>
      %108 = tpu.matmul %102, %107, %cst_48 {dimension_numbers = #tpu.dot_dimension_numbers<[1], [0], [0], [1], [0, 0, 1, 1], [], []>} : vector<8x64xbf16>, vector<64x64xbf16>, vector<8x64xf32> -> vector<8x64xf32>
      %109 = arith.truncf %108 : vector<8x64xf32> to vector<8x64xbf16>
      %c0_49 = arith.constant 0 : index
      %c0_50 = arith.constant 0 : index
      %110 = vector.load %arg11[%c0_49, %c0_50] : memref<8x64xbf16, #tpu.memory_space<vmem>>, vector<8x64xbf16>
      tpu.vector_store %arg11[%c0_49, %c0_50], %109 {strides = array<i32>} : memref<8x64xbf16, #tpu.memory_space<vmem>>, vector<8x64xbf16>,
    } else {
    }
    %c0 = arith.constant 0 : index
    %c0_1 = arith.constant 0 : index
    %c0_2 = arith.constant 0 : index
    %3 = vector.load %arg2[%c0, %c0_1, %c0_2] : memref<1x8x96xf32, #tpu.memory_space<vmem>>, vector<1x8x96xf32>
    %4 = vector.shape_cast %3 : vector<1x8x96xf32> to vector<8x96xf32>
    %5 = arith.truncf %4 : vector<8x96xf32> to vector<8x96xbf16>
    %c0_3 = arith.constant 0 : index
    %c0_4 = arith.constant 0 : index
    %6 = vector.load %arg6[%c0_3, %c0_4] : memref<96x96xbf16, #tpu.memory_space<vmem>>, vector<96x96xbf16>
    %cst = arith.constant dense<0.000000e+00> : vector<8x96xf32>
    %7 = tpu.matmul %5, %6, %cst {dimension_numbers = #tpu.dot_dimension_numbers<[1], [0], [0], [1], [0, 0, 1, 1], [], []>} : vector<8x96xbf16>, vector<96x96xbf16>, vector<8x96xf32> -> vector<8x96xf32>
    %cst_5 = arith.constant 0.353553385 : f32
    %8 = vector.broadcast %cst_5 : f32 to vector<8x96xf32>
    %9 = arith.mulf %7, %8 : vector<8x96xf32>
    %10 = arith.truncf %9 : vector<8x96xf32> to vector<8x96xbf16>
    %c0_6 = arith.constant 0 : index
    %c0_7 = arith.constant 0 : index
    %c0_8 = arith.constant 0 : index
    %11 = vector.load %arg5[%c0_6, %c0_7, %c0_8] : memref<1x8x8xbf16, #tpu.memory_space<vmem>>, vector<1x8x8xbf16>
    %12 = vector.shape_cast %11 : vector<1x8x8xbf16> to vector<8x8xbf16>
    %13 = arith.extf %12 : vector<8x8xbf16> to vector<8x8xf32>
    %cst_9 = arith.constant dense<0.000000e+00> : vector<8xf32>
    %14 = vector.multi_reduction <add>, %13, %cst_9 [1] : vector<8x8xf32> to vector<8xf32>
    %15 = vector.shape_cast %14 : vector<8xf32> to vector<8x1xf32>
    %cst_10 = arith.constant 4.000000e+00 : f32
    %16 = vector.broadcast %cst_10 : f32 to vector<8x1xf32>
    %17 = arith.mulf %16, %15 : vector<8x1xf32>
    %cst_11 = arith.constant 1.000000e-30 : f32
    %18 = vector.broadcast %cst_11 : f32 to vector<8x1xf32>
    %19 = arith.maximumf %17, %18 : vector<8x1xf32>
    %20 = tpu.reciprocal %19 {approx = true} : vector<8x1xf32> -> vector<8x1xf32>
    %21 = vector.broadcast %20 : vector<8x1xf32> to vector<8x8xf32>
    %22 = arith.mulf %13, %21 : vector<8x8xf32>
    %c0_12 = arith.constant 0 : index
    %c0_13 = arith.constant 0 : index
    %23 = vector.load %arg10[%c0_12, %c0_13] : memref<8x96xbf16, #tpu.memory_space<vmem>>, vector<8x96xbf16>
    %c0_14 = arith.constant 0 : index
    %c0_15 = arith.constant 0 : index
    %24 = vector.load %arg11[%c0_14, %c0_15] : memref<8x64xbf16, #tpu.memory_space<vmem>>, vector<8x64xbf16>
    %25 = vector.extract_strided_slice %10 {offsets = [0, 0], sizes = [8, 24], strides = [1, 1]} : vector<8x96xbf16> to vector<8x24xbf16>
    %26 = vector.extract_strided_slice %23 {offsets = [0, 0], sizes = [8, 24], strides = [1, 1]} : vector<8x96xbf16> to vector<8x24xbf16>
    %27 = vector.extract_strided_slice %24 {offsets = [0, 0], sizes = [8, 16], strides = [1, 1]} : vector<8x64xbf16> to vector<8x16xbf16>
    %cst_16 = arith.constant dense<0.000000e+00> : vector<8x8xf32>
    %28 = tpu.matmul %25, %26, %cst_16 {dimension_numbers = #tpu.dot_dimension_numbers<[1], [1], [0], [0], [0, 0, 1, 0], [], []>} : vector<8x24xbf16>, vector<8x24xbf16>, vector<8x8xf32> -> vector<8x8xf32>
    %cst_17 = arith.constant dense<0xFF800000> : vector<8xf32>
    %29 = vector.multi_reduction <maximumf>, %28, %cst_17 [1] : vector<8x8xf32> to vector<8xf32>
    %30 = vector.shape_cast %29 : vector<8xf32> to vector<8x1xf32>
    %31 = vector.broadcast %30 : vector<8x1xf32> to vector<8x8xf32>
    %32 = arith.subf %28, %31 : vector<8x8xf32>
    %33 = math.exp %32 : vector<8x8xf32>
    %cst_18 = arith.constant dense<0.000000e+00> : vector<8xf32>
    %34 = vector.multi_reduction <add>, %33, %cst_18 [1] : vector<8x8xf32> to vector<8xf32>
    %35 = vector.shape_cast %34 : vector<8xf32> to vector<8x1xf32>
    %36 = arith.mulf %33, %22 : vector<8x8xf32>
    %37 = arith.truncf %36 : vector<8x8xf32> to vector<8x8xbf16>
    %cst_19 = arith.constant dense<0.000000e+00> : vector<8x16xf32>
    %38 = tpu.matmul %37, %27, %cst_19 {dimension_numbers = #tpu.dot_dimension_numbers<[1], [0], [0], [1], [0, 0, 1, 1], [], []>} : vector<8x8xbf16>, vector<8x16xbf16>, vector<8x16xf32> -> vector<8x16xf32>
    %39 = tpu.reciprocal %35 {approx = true} : vector<8x1xf32> -> vector<8x1xf32>
    %40 = vector.broadcast %39 : vector<8x1xf32> to vector<8x16xf32>
    %41 = arith.mulf %38, %40 : vector<8x16xf32>
    %42 = vector.extract_strided_slice %10 {offsets = [0, 24], sizes = [8, 24], strides = [1, 1]} : vector<8x96xbf16> to vector<8x24xbf16>
    %43 = vector.extract_strided_slice %23 {offsets = [0, 24], sizes = [8, 24], strides = [1, 1]} : vector<8x96xbf16> to vector<8x24xbf16>
    %44 = vector.extract_strided_slice %24 {offsets = [0, 16], sizes = [8, 16], strides = [1, 1]} : vector<8x64xbf16> to vector<8x16xbf16>
    %cst_20 = arith.constant dense<0.000000e+00> : vector<8x8xf32>
    %45 = tpu.matmul %42, %43, %cst_20 {dimension_numbers = #tpu.dot_dimension_numbers<[1], [1], [0], [0], [0, 0, 1, 0], [], []>} : vector<8x24xbf16>, vector<8x24xbf16>, vector<8x8xf32> -> vector<8x8xf32>
    %cst_21 = arith.constant dense<0xFF800000> : vector<8xf32>
    %46 = vector.multi_reduction <maximumf>, %45, %cst_21 [1] : vector<8x8xf32> to vector<8xf32>
    %47 = vector.shape_cast %46 : vector<8xf32> to vector<8x1xf32>
    %48 = vector.broadcast %47 : vector<8x1xf32> to vector<8x8xf32>
    %49 = arith.subf %45, %48 : vector<8x8xf32>
    %50 = math.exp %49 : vector<8x8xf32>
    %cst_22 = arith.constant dense<0.000000e+00> : vector<8xf32>
    %51 = vector.multi_reduction <add>, %50, %cst_22 [1] : vector<8x8xf32> to vector<8xf32>
    %52 = vector.shape_cast %51 : vector<8xf32> to vector<8x1xf32>
    %53 = arith.mulf %50, %22 : vector<8x8xf32>
    %54 = arith.truncf %53 : vector<8x8xf32> to vector<8x8xbf16>
    %cst_23 = arith.constant dense<0.000000e+00> : vector<8x16xf32>
    %55 = tpu.matmul %54, %44, %cst_23 {dimension_numbers = #tpu.dot_dimension_numbers<[1], [0], [0], [1], [0, 0, 1, 1], [], []>} : vector<8x8xbf16>, vector<8x16xbf16>, vector<8x16xf32> -> vector<8x16xf32>
    %56 = tpu.reciprocal %52 {approx = true} : vector<8x1xf32> -> vector<8x1xf32>
    %57 = vector.broadcast %56 : vector<8x1xf32> to vector<8x16xf32>
    %58 = arith.mulf %55, %57 : vector<8x16xf32>
    %59 = vector.extract_strided_slice %10 {offsets = [0, 48], sizes = [8, 24], strides = [1, 1]} : vector<8x96xbf16> to vector<8x24xbf16>
    %60 = vector.extract_strided_slice %23 {offsets = [0, 48], sizes = [8, 24], strides = [1, 1]} : vector<8x96xbf16> to vector<8x24xbf16>
    %61 = vector.extract_strided_slice %24 {offsets = [0, 32], sizes = [8, 16], strides = [1, 1]} : vector<8x64xbf16> to vector<8x16xbf16>
    %cst_24 = arith.constant dense<0.000000e+00> : vector<8x8xf32>
    %62 = tpu.matmul %59, %60, %cst_24 {dimension_numbers = #tpu.dot_dimension_numbers<[1], [1], [0], [0], [0, 0, 1, 0], [], []>} : vector<8x24xbf16>, vector<8x24xbf16>, vector<8x8xf32> -> vector<8x8xf32>
    %cst_25 = arith.constant dense<0xFF800000> : vector<8xf32>
    %63 = vector.multi_reduction <maximumf>, %62, %cst_25 [1] : vector<8x8xf32> to vector<8xf32>
    %64 = vector.shape_cast %63 : vector<8xf32> to vector<8x1xf32>
    %65 = vector.broadcast %64 : vector<8x1xf32> to vector<8x8xf32>
    %66 = arith.subf %62, %65 : vector<8x8xf32>
    %67 = math.exp %66 : vector<8x8xf32>
    %cst_26 = arith.constant dense<0.000000e+00> : vector<8xf32>
    %68 = vector.multi_reduction <add>, %67, %cst_26 [1] : vector<8x8xf32> to vector<8xf32>
    %69 = vector.shape_cast %68 : vector<8xf32> to vector<8x1xf32>
    %70 = arith.mulf %67, %22 : vector<8x8xf32>
    %71 = arith.truncf %70 : vector<8x8xf32> to vector<8x8xbf16>
    %cst_27 = arith.constant dense<0.000000e+00> : vector<8x16xf32>
    %72 = tpu.matmul %71, %61, %cst_27 {dimension_numbers = #tpu.dot_dimension_numbers<[1], [0], [0], [1], [0, 0, 1, 1], [], []>} : vector<8x8xbf16>, vector<8x16xbf16>, vector<8x16xf32> -> vector<8x16xf32>
    %73 = tpu.reciprocal %69 {approx = true} : vector<8x1xf32> -> vector<8x1xf32>
    %74 = vector.broadcast %73 : vector<8x1xf32> to vector<8x16xf32>
    %75 = arith.mulf %72, %74 : vector<8x16xf32>
    %76 = vector.extract_strided_slice %10 {offsets = [0, 72], sizes = [8, 24], strides = [1, 1]} : vector<8x96xbf16> to vector<8x24xbf16>
    %77 = vector.extract_strided_slice %23 {offsets = [0, 72], sizes = [8, 24], strides = [1, 1]} : vector<8x96xbf16> to vector<8x24xbf16>
    %78 = vector.extract_strided_slice %24 {offsets = [0, 48], sizes = [8, 16], strides = [1, 1]} : vector<8x64xbf16> to vector<8x16xbf16>
    %cst_28 = arith.constant dense<0.000000e+00> : vector<8x8xf32>
    %79 = tpu.matmul %76, %77, %cst_28 {dimension_numbers = #tpu.dot_dimension_numbers<[1], [1], [0], [0], [0, 0, 1, 0], [], []>} : vector<8x24xbf16>, vector<8x24xbf16>, vector<8x8xf32> -> vector<8x8xf32>
    %cst_29 = arith.constant dense<0xFF800000> : vector<8xf32>
    %80 = vector.multi_reduction <maximumf>, %79, %cst_29 [1] : vector<8x8xf32> to vector<8xf32>
    %81 = vector.shape_cast %80 : vector<8xf32> to vector<8x1xf32>
    %82 = vector.broadcast %81 : vector<8x1xf32> to vector<8x8xf32>
    %83 = arith.subf %79, %82 : vector<8x8xf32>
    %84 = math.exp %83 : vector<8x8xf32>
    %cst_30 = arith.constant dense<0.000000e+00> : vector<8xf32>
    %85 = vector.multi_reduction <add>, %84, %cst_30 [1] : vector<8x8xf32> to vector<8xf32>
    %86 = vector.shape_cast %85 : vector<8xf32> to vector<8x1xf32>
    %87 = arith.mulf %84, %22 : vector<8x8xf32>
    %88 = arith.truncf %87 : vector<8x8xf32> to vector<8x8xbf16>
    %cst_31 = arith.constant dense<0.000000e+00> : vector<8x16xf32>
    %89 = tpu.matmul %88, %78, %cst_31 {dimension_numbers = #tpu.dot_dimension_numbers<[1], [0], [0], [1], [0, 0, 1, 1], [], []>} : vector<8x8xbf16>, vector<8x16xbf16>, vector<8x16xf32> -> vector<8x16xf32>
    %90 = tpu.reciprocal %86 {approx = true} : vector<8x1xf32> -> vector<8x1xf32>
    %91 = vector.broadcast %90 : vector<8x1xf32> to vector<8x16xf32>
    %92 = arith.mulf %89, %91 : vector<8x16xf32>
    %93 = tpu.concatenate %41, %58, %75, %92 in 1 : vector<8x16xf32>, vector<8x16xf32>, vector<8x16xf32>, vector<8x16xf32> -> vector<8x64xf32>
    %c0_32 = arith.constant 0 : index
    %c0_33 = arith.constant 0 : index
    %c0_34 = arith.constant 0 : index
    %94 = vector.load %arg9[%c0_32, %c0_33, %c0_34] : memref<1x8x64xf32, #tpu.memory_space<vmem>>, vector<1x8x64xf32>
    %95 = vector.shape_cast %94 : vector<1x8x64xf32> to vector<8x64xf32>
    %96 = vector.shape_cast %93 : vector<8x64xf32> to vector<1x8x64xf32>
    tpu.vector_store %arg9[%c0_32, %c0_33, %c0_34], %96 {strides = array<i32>} : memref<1x8x64xf32, #tpu.memory_space<vmem>>, vector<1x8x64xf32>,
    return
  }
  func.func @transform_0(%arg0: i32, %arg1: i32) -> (i32, i32, i32) {
    %c0_i32 = arith.constant 0 : i32
    %c0_i32_0 = arith.constant 0 : i32
    return %arg0, %arg1, %c0_i32 : i32, i32, i32
  }
  func.func @transform_1(%arg0: i32, %arg1: i32) -> (i32, i32, i32) {
    %c0_i32 = arith.constant 0 : i32
    %c0_i32_0 = arith.constant 0 : i32
    %c0_i32_1 = arith.constant 0 : i32
    return %arg0, %c0_i32, %c0_i32_0 : i32, i32, i32
  }
  func.func @transform_2(%arg0: i32, %arg1: i32) -> (i32, i32, i32) {
    %c0_i32 = arith.constant 0 : i32
    %c0_i32_0 = arith.constant 0 : i32
    %c0_i32_1 = arith.constant 0 : i32
    return %arg0, %c0_i32, %c0_i32_0 : i32, i32, i32
  }
  func.func @transform_3(%arg0: i32, %arg1: i32) -> (i32, i32, i32) {
    %c0_i32 = arith.constant 0 : i32
    %c0_i32_0 = arith.constant 0 : i32
    return %arg0, %arg1, %c0_i32 : i32, i32, i32
  }
  func.func @transform_4(%arg0: i32, %arg1: i32) -> (i32, i32) {
    %c0_i32 = arith.constant 0 : i32
    %c0_i32_0 = arith.constant 0 : i32
    %c0_i32_1 = arith.constant 0 : i32
    return %c0_i32, %c0_i32_0 : i32, i32
  }
  func.func @transform_5(%arg0: i32, %arg1: i32) -> (i32, i32) {
    %c0_i32 = arith.constant 0 : i32
    %c0_i32_0 = arith.constant 0 : i32
    %c0_i32_1 = arith.constant 0 : i32
    return %c0_i32, %c0_i32_0 : i32, i32
  }
  func.func @transform_6(%arg0: i32, %arg1: i32) -> (i32, i32) {
    %c0_i32 = arith.constant 0 : i32
    %c0_i32_0 = arith.constant 0 : i32
    %c0_i32_1 = arith.constant 0 : i32
    return %c0_i32, %c0_i32_0 : i32, i32
  }
  func.func @transform_7(%arg0: i32, %arg1: i32) -> (i32, i32, i32) {
    %c0_i32 = arith.constant 0 : i32
    %c0_i32_0 = arith.constant 0 : i32
    return %arg0, %arg1, %c0_i32 : i32, i32, i32
  }
}

</mosaic_0001>

<bundles_post_ra>
// kernel: tpu_custom_call.1
= control target key start
LH: loop header
LB: loop body
LE: loop exit
PB: predicated region body
PF: predicated region fallthrough
CT: control target
= control target key end

     0   :  { %s2012_s0 = inlined_call_operand.hbm [shape: f32[2,8,96], index: 0, kind: input, shape index: {}]   ;;  %s2013_s1 = inlined_call_operand.hbm [shape: f32[2,8,96], index: 1, kind: input, shape index: {}]   ;;  %s2014_s2 = inlined_call_operand.hbm [shape: f32[2,8,64], index: 2, kind: input, shape index: {}]   ;;  %s2015_s3 = inlined_call_operand.hbm [shape: bf16[2,8,8], index: 3, kind: input, shape index: {}]   ;;  %s2016_s4 = inlined_call_operand.hbm [shape: bf16[96,96], index: 4, kind: input, shape index: {}]   ;;  %s2017_s5 = inlined_call_operand.hbm [shape: bf16[96,96], index: 5, kind: input, shape index: {}]   ;;  %s2018_s6 = inlined_call_operand.hbm [shape: bf16[64,64], index: 6, kind: input, shape index: {}]   ;;  %s2019_s7 = inlined_call_operand.hbm [shape: f32[2,8,64], index: 7, kind: output, shape index: {}]  }
   0x1   :  { %2027 = sst [smem:[#allocation28_spill]] %s2013_s1 }
   0x2   :  { %2028 = sst [smem:[#allocation29_spill]] %s2016_s4 }
   0x3   :  { %2029 = sst [smem:[#allocation30_spill]] %s2017_s5 }
   0x4   :  { %2030 = sst [smem:[#allocation31_spill]] %s2018_s6 }
   0x5   :  { %12 = vsyncpa [#allocation5], 0 }
   0x6   :  { %14 = vsyncpa [#allocation5 + $0x1], 0 }
   0x7   :  { %15 = vsyncpa [#allocation8], 0 }
   0x8   :  { %17 = vsyncpa [#allocation8 + $0x1], 0 }
   0x9   :  { %18 = vsyncpa [#allocation11], 0 }
   0xa   :  { %20 = vsyncpa [#allocation11 + $0x1], 0 }
   0xb   :  { %21 = vsyncpa [#allocation14], 0 }
   0xc   :  { %22 = vsyncpa [#allocation6], 0 }
   0xd   :  { %24 = vsyncpa [#allocation6 + $0x1], 0  ;;  %s1752_s24 = smov 0   ;;  %s1754_s25 = smov 0  }
   0xe   :  { %s1756_s26 = smov 0   ;;  %s1758_s27 = smov 0  }
   0xf   :  { %s1760_s28 = smov 0   ;;  %s1762_s29 = smov 0  }
  0x10 LB: > { %2031 = sst [smem:[#allocation23_spill]] %s1677_s24  ;;  %s1783_s30 = sadd.s32 4294967295, %s1697_s29   ;;  %s1697_s29 = sphi %s1762_s29, %s30_s29   ;;  %s1693_s28 = sphi %s1760_s28, %s2058_s28   ;;  %s1689_s27 = sphi %s1758_s27, %s2057_s27   ;;  %s1685_s26 = sphi %s1756_s26, %s2053_s26   ;;  %s1681_s25 = sphi %s1754_s25, %s2056_s25   ;;  %s1677_s24 = sphi %s1752_s24, %s2055_s24  }
  0x11   : > { %2032 = sst [smem:[#allocation24_spill]] %s1685_s26  ;;  %s1135_s8 = sadd.s32 4294967294, %s1697_s29  }
  0x12   : > { %p64_p0 = scmp.ne.s32.totalorder %s1681_s25, %s1677_s24  ;;  %p65_p1 = scmp.eq.s32.totalorder %s1783_s30, 0 }
  0x13   : > { %p233_p2 = scmp.eq.s32.totalorder %s1783_s30, 1  ;;  %p239_p3 = scmp.eq.s32.totalorder %s1135_s8, 1 }
  0x14   : > { %p1792_p4 = por %p65_p1, %p64_p0  ;;  %p1136_p5 = scmp.ge.s32.totalorder %s1697_s29, 1 }
  0x15   : > { %p1797_p6 = por %p239_p3, %p64_p0  ;;  %p246_p7 = scmp.lt.s32.totalorder %s1697_s29, 3 }
  0x16   : > { %s2036_s4 = sld [smem:[#allocation29_spill]]  ;;  %s1699_s15 = smov [#allocation12]  }
  0x17   : > { %s2034_s10 = scalar_select %p1797_p6, 1, 0 }
  0x18   : > { %p1805_p8 = pnand %p1136_p5, %p246_p7  ;;  %s259_s16 = sshll.u32 %s1699_s15, 4  ;;  %s260_s16 = int_to_ptr.vmem [resolvable:$true] %s259_s16 }
  0x19   : > { %2035 = sst [smem:[#allocation25_spill]] %s2034_s10  ;;  %s2020_s21 = smov 64  }
  0x1a   : > { %p1275_p9 = pneg %p1805_p8  ;;  %s2039_s5 = sld [smem:[#allocation30_spill]] }
  0x1b   : > { %s2021_s22 = smov 4   ;;  %s1702_s23 = smov [#allocation13]  }
  0x1c   : > { %s257_s13 = sshll.u32 %s2036_s4, 4  ;;  %p1813_p10 = pnand %p1275_p9, %p65_p1  ;;  %s258_s13 = int_to_ptr.hbm [resolvable:$true] %s257_s13 }
  0x1d   : > { %s273_s8 = sshll.u32 %s1702_s23, 4  ;;  %s42_s11 = sadd.s32 1, %s1693_s28  ;;  %s274_s8 = int_to_ptr.vmem [resolvable:$true] %s273_s8 }
  0x1e   : > { %1278 = dma.hbm_to_vmem [thread:$0]  (!%p1813_p10), %s258_s13, 768, %s260_s16, [#allocation11], %s2020_s21, %s2020_s21, %s2021_s22  }
  0x1f   : > { %s51_s12 = sadd.s32 1, %s1685_s26  ;;  %p44_p12 = scmp.ge.s32.totalorder %s42_s11, 2 }
  0x20   : > { %s271_s20 = sshll.u32 %s2039_s5, 4  ;;  %p58_p13 = scmp.ne.s32.totalorder %s1685_s26, %s1681_s25  ;;  %s272_s20 = int_to_ptr.hbm [resolvable:$true] %s271_s20 }
  0x21   : > { %1281 = dma.hbm_to_vmem [thread:$0]  (!%p1813_p10), %s272_s20, 768, %s274_s8, [#allocation14], %s2020_s21, %s2020_s21, %s2021_s22  }
  0x22   : > { %p59_p0 = scmp.eq.s32.totalorder %s1697_s29, 0  ;;  %p1305_p3 = scmp.lt.s32.totalorder %s1697_s29, 2 }
  0x23   : > { %s2060_s11 = smov (%p44_p12, %s42_s11), 0  ;;  %p1841_p7 = por %p233_p2, %p58_p13 }
  0x24   : > { %2040 = sst [smem:[#allocation26_spill]] %s2060_s11  ;;  %p60_p5 = por %p59_p0, %p58_p13 }
  0x25   : > { %s46_s15 = ssub.s32 %s1693_s28, %s2060_s11  ;;  %s1848_s16 = sand.u32 1, %s1685_s26  }
  0x26   : > { %p49_p9 = scmp.eq.s32.totalorder %s46_s15, 0  ;;  %s1851_s18 = sshll.u32 %s1848_s16, 3 }
  0x27   : > { %s1142_s19 = sshll.u32 %s1693_s28, 3  ;;  %p1854_p11 = pnand %p1305_p3, %p60_p5 }
  0x28   : > { %s1859_s23 = scalar_select %p49_p9, %s1685_s26, %s51_s12  }
  0x29   : > { %s2026_s8 = sand.u32 1, %s1697_s29   ;;  %s2044_s1 = sld [smem:[#allocation28_spill]] }
  0x2a   : > { %2043 = sst [smem:[#allocation27_spill]] %s1859_s23  ;;  %s325_s5 = scalar_lea.vmem [#allocation7], %s1851_s18 }
  0x2b   : > { %s333_s15 = sshll.u32 %s325_s5, 4  ;;  %s322_s10 = scalar_lea.sflag [#allocation8], %s2026_s8  ;;  %s334_s15 = int_to_ptr.vmem [resolvable:$true] %s333_s15 }
  0x2c   : > { %s2045_s6 = sld [smem:[#allocation31_spill]]  ;;  %s1703_s21 = smov [#allocation15]  }
  0x2d   : > { %s287_s22 = sshll.u32 %s1703_s21, 4  ;;  %s2046_s5 = smov 4   ;;  %s288_s22 = int_to_ptr.vmem [resolvable:$true] %s287_s22 }
  0x2e   : > { %s305_s24 = scalar_lea.vmem [#allocation4], %s1851_s18  ;;  %s302_s8 = scalar_lea.sflag [#allocation5], %s1848_s16 }
  0x2f   : > { %s329_s4 = scalar_lea.hbm %s2044_s1, %s1142_s19  ;;  %s314_s12 = sshll.u32 %s305_s24, 4  ;;  %s315_s12 = int_to_ptr.vmem [resolvable:$true] %s314_s12 }
  0x30   : > { %s331_s11 = sshll.u32 %s329_s4, 4  ;;  %s2047_s4 = smov 64   ;;  %s332_s11 = int_to_ptr.hbm [resolvable:$true] %s331_s11 }
  0x31   : > { %1291 = dma.hbm_to_vmem [thread:$0]  (!%p1854_p11), %s332_s11, 128, %s334_s15, %s322_s10  }
  0x32   : > { %s285_s23 = sshll.u32 %s2045_s6, 4  ;;  %s310_s11 = scalar_lea.hbm %s2012_s0, %s1142_s19  ;;  %s286_s23 = int_to_ptr.hbm [resolvable:$true] %s285_s23 }
  0x33   : > { %1284 = dma.hbm_to_vmem [thread:$0]  (!%p1813_p10), %s286_s23, 512, %s288_s22, [#allocation14], %s2047_s4, %s2047_s4, %s2046_s5  }
  0x34   : > { %s312_s15 = sshll.u32 %s310_s11, 4  ;;  %s348_s6 = scalar_lea.hbm %s2014_s2, %s1142_s19  ;;  %s313_s15 = int_to_ptr.hbm [resolvable:$true] %s312_s15 }
  0x35   : > { %1288 = dma.hbm_to_vmem [thread:$0]  (!%p1854_p11), %s313_s15, 128, %s315_s12, %s302_s8  }
  0x36   : > { %s350_s23 = sshll.u32 %s348_s6, 4  ;;  %s344_s22 = scalar_lea.vmem [#allocation9], %s1851_s18  ;;  %s351_s23 = int_to_ptr.hbm [resolvable:$true] %s350_s23 }
  0x37   : > { %s352_s1 = sshll.u32 %s344_s22, 4  ;;  %s1147_s26 = sshll.u32 %s1848_s16, 2  ;;  %s353_s1 = int_to_ptr.vmem [resolvable:$true] %s352_s1 }
  0x38   : > { %1294 = dma.hbm_to_vmem [thread:$0]  (!%p1854_p11), %s351_s23, 128, %s353_s1, %s322_s10  }
  0x39   : > { %s1148_s5 = sshll.u32 %s1693_s28, 2  ;;  %s363_s15 = scalar_lea.vmem [#allocation10], %s1147_s26 }
  0x3a   : > { %s368_s24 = scalar_lea.hbm %s2015_s3, %s1148_s5  ;;  %s372_s12 = sshll.u32 %s363_s15, 4  ;;  %s373_s12 = int_to_ptr.vmem [resolvable:$true] %s372_s12 }
  0x3b   : > { %s370_s8 = sshll.u32 %s368_s24, 4  ;;  %s2048_s19 = sand.u32 1, %s1697_s29   ;;  %s371_s8 = int_to_ptr.hbm [resolvable:$true] %s370_s8 }
  0x3c   : > { %s360_s17 = scalar_lea.sflag [#allocation11], %s2048_s19  ;;  %381 = sbr.rel (%p1805_p8) target bundleno = 898 (0x382), region = 48 }
  0x3d   : > { %1297 = dma.hbm_to_vmem [thread:$0]  (!%p1854_p11), %s371_s8, 64, %s373_s12, %s360_s17  }
  0x3e   : > { %s1903_s6 = sand.u32 (!%p1805_p8), 1, %s1681_s25  }
  0x3f   : > { %s1906_s10 = sshll.u32 (!%p1805_p8), %s1903_s6, 3  ;;  %s384_s16 = scalar_lea.sflag (!%p1805_p8), [#allocation5], %s1903_s6 }
  0x40   : > { %s387_s18 = scalar_lea.vmem (!%p1805_p8), [#allocation4], %s1906_s10 }
  0x41   : > { %1652 = dma.done.wait (%p1792_p4), %s384_s16, 128  }
  0x42   : > { %1654 = vsyncadd (%p1792_p4), %s384_s16, 4294967168  ;;  %s393_s14 = sand.u32 1, %s1783_s30   ;;  %s397_s21 = scalar_lea.vmem [#allocation7], %s1906_s10 }
  0x43   : > { %s394_s20 = scalar_lea.sflag [#allocation8], %s393_s14 }
  0x44   : > { %1656 = dma.done.wait (%p1792_p4), %s394_s20, 256  }
  0x45   : > { %1658 = vsyncadd (%p1792_p4), %s394_s20, 4294967040  ;;  %s1153_s23 = sshll.u32 %s1903_s6, 2  ;;  %s407_s22 = scalar_lea.vmem [#allocation9], %s1906_s10 }
  0x46   : > { %s414_s1 = scalar_lea.sflag [#allocation11], %s393_s14  ;;  %s1922_s26 = scalar_lea.vmem [#allocation10], %s1153_s23 }
  0x47   : > { %1660 = dma.done.wait (%p1792_p4), %s414_s1, 64  }
  0x48   : > { %1662 = vsyncadd (%p1792_p4), %s414_s1, 4294967232 }
  0x49   : > { %1664 = dma.done.wait (%p65_p1), [#allocation11], 768  }
  0x4a   : > { %1666 = vsyncadd (%p65_p1), [#allocation11], 4294966528 }
  0x4b   : > { %1668 = dma.done.wait (%p65_p1), [#allocation14], 1280  }
  0x4c   : > { %1670 = vsyncadd (%p65_p1), [#allocation14], 4294966016  ;;  %v1242_v0 = vld [vmem:[#allocation13 + $0x28] sm:$0xff]  ;;  %v1252_v1 = vld [vmem:[#allocation12 + $0x28] sm:$0xff]  ;;  %vm536_vm0 = vcmask 785408   ;;  %vm554_vm1 = vcmask 781312  }
  0x4d   : > { %542 = vmatpush.bf16.msra.mxu0 %v1242_v0  ;;  %664 = vmatpush.bf16.msra.mxu2 %v1252_v1  ;;  %v1241_v2 = vld [vmem:[#allocation13 + $0x20] sm:$0xff]  ;;  %v1251_v3 = vld [vmem:[#allocation12 + $0x20] sm:$0xff]  ;;  %v1240_v4 = vld [vmem:[#allocation13 + $0x18] sm:$0xff]  ;;  %vm689_vm2 = vcmask 195584   ;;  %s1704_s30 = smov 104   ;;  %s1705_s9 = smov 56  }
  0x4e   : > { %v1250_v5 = vld [vmem:[#allocation12 + $0x18] sm:$0xff]  ;;  %v1239_v6 = vld [vmem:[#allocation13 + $0x10] sm:$0xff]  ;;  %v1249_v7 = vld [vmem:[#allocation12 + $0x10] sm:$0xff]  ;;  %s1706_s5 = smov 80   ;;  %vm588_vm3 = vcmask 523264   ;;  %vm679_vm4 = vcmask 64512  }
  0x4f   : > { %v1238_v8 = vld [vmem:[#allocation13 + $0x8] sm:$0xff]  ;;  %v1248_v9 = vld [vmem:[#allocation12 + $0x8] sm:$0xff]  ;;  %v1237_v10 = vld [vmem:[#allocation13] sm:$0xff]  ;;  %vm606_vm5 = vcmask 519168   ;;  %vm723_vm6 = vcmask 1043456   ;;  %s1707_s4 = smov 112  }
  0x50   : > { %v1247_v11 = vld [vmem:[#allocation12] sm:$0xff]  ;;  %v608_v13 = vld [vmem:[%s387_s18] sm:$0xff]  ;;  %v1246_v16 = vld [vmem:[#allocation15 + $0x18] sm:$0xff]  ;;  %s1708_s11 = smov 96   ;;  %s1709_s24 = smov 16   ;;  %vm934_vm7 = vcmask 130048  }
  0x51   : > { %543 = vmatpush.bf16.msra.mxu0 %v1241_v2  ;;  %665 = vmatpush.bf16.msra.mxu2 %v1251_v3  ;;  %v484_v12 = vld [vmem:[%s397_s21] sm:$0xff]  ;;  %v609_v15 = vpack.c.bf16 %v608_v13, %v608_v13  ;;  %v1245_v17 = vld [vmem:[#allocation15 + $0x10] sm:$0xff]  ;;  %v1244_v31 = vld [vmem:[#allocation15 + $0x8] sm:$0xff]  ;;  %s1710_s8 = smov 32   ;;  %s1711_s15 = smov 48   ;;  %vm936_vm8 = vcmask 261120  }
  0x52   : > { %v485_v14 = vpack.c.bf16 %v484_v12, %v484_v12  ;;  %596 = vmatpush.bf16.msra.mxu1 %v1246_v16  ;;  %v1243_v32 = vld [vmem:[#allocation15] sm:$0xff]  ;;  %v486_v33 = vld [vmem:[%s407_s22] sm:$0xff]  ;;  %v677_v35 = vld [vmem:[%s1922_s26] sm:$0xf]  ;;  %s1234_s12 = sshll.u32 %s1689_s27, 3  ;;  %s478_s18 = scalar_lea.vmem [#allocation16], %s1906_s10 }
  0x53   : > { %v487_v34 = vpack.c.bf16 %v486_v33, %v486_v33  ;;  %v678_v36 = vunpack.c.l.bf16 %v677_v35  ;;  %s954_s16 = scalar_lea.hbm %s2019_s7, %s1234_s12  ;;  %s956_s14 = sshll.u32 %s478_s18, 4  ;;  %vm938_vm9 = vcmask 392192   ;;  %s957_s14 = int_to_ptr.vmem [resolvable:$true] %s956_s14 }
  0x54   : > { %s958_s20 = sshll.u32 %s954_s16, 4  ;;  %s943_s27 = scalar_lea.sflag [#allocation6], %s1903_s6  ;;  %s959_s20 = int_to_ptr.hbm [resolvable:$true] %s958_s20 }
  0x55   : > { %544 = vmatpush.bf16.msra.mxu0 %v1240_v4  ;;  %666 = vmatpush.bf16.msra.mxu2 %v1250_v5  ;;  %v680_v37 = vsel %vm679_vm4, %v678_v36, 0.0  ;;  %s1613_s21 = sshra.s32 %s959_s20, 4  ;;  %s1619_s1 = scalar_lea.hbm %s2019_s7, 16  ;;  %s1614_s21 = int_to_ptr.hbm [resolvable:$true] %s1613_s21 }
  0x56   : > { %597 = vmatpush.bf16.msra.mxu1 %v1245_v17  ;;  %s1615_s23 = scalar_lea.hbm %s1614_s21, 8  ;;  %p1620_p8 = scmp.lt.s32.totalorder %s1614_s21, %s2019_s7 }
  0x57   : > { %p1616_p1 = scmp.ne.s32.totalorder %s1614_s21, %s1615_s23  ;;  %p1621_p10 = scmp.lt.s32.totalorder %s1619_s1, %s1615_s23 }
  0x59   : > { %545 = vmatpush.bf16.msra.mxu0 %v1239_v6  ;;  %667 = vmatpush.bf16.msra.mxu2 %v1249_v7  ;;  %p1617_p2 = pnand %p1616_p1, %p1841_p7  ;;  %p1622_p11 = por %p1621_p10, %p1620_p8 }
  0x5a   : > { %598 = vmatpush.bf16.msra.mxu1 %v1244_v31 }
  0x5b   : > { %p1618_p4 = pneg %p1617_p2 }
  0x5d   : > { %546 = vmatpush.bf16.msra.mxu0 %v1238_v8  ;;  %668 = vmatpush.bf16.msra.mxu2 %v1248_v9  ;;  %p1623_p12 = pnand %p1622_p11, %p1618_p4 }
  0x5e   : > { %599 = vmatpush.bf16.msra.mxu1 %v1243_v32 }
  0x61   : > { %547 = vmatpush.bf16.msra.mxu0 %v1237_v10  ;;  %669 = vmatpush.bf16.msra.mxu2 %v1247_v11 }
  0x62   : > { %1199 = vmatmul.msk.bf16.vlgmr.msra.gmra.mxu1 %vm588_vm3, %v487_v34 }
  0x64   : > { %1182 = vmatmul.msk.bf16.vlgmr.msra.gmra.mxu0 %vm536_vm0, %v485_v14  ;;  %1224 = vmatmul.msk.bf16.vlgmr.msra.gmra.mxu2 %vm536_vm0, %v609_v15 }
  0xdf   : > { %v601_v50 = vpop.f32.mrf.mxu1 }
  0xe0   : > { %v605_v51 = vpack.c.bf16 %v601_v50, %v601_v50 }
  0xe1   : > { %v549_v18 = vpop.f32.mrf.mxu0 }
  0xe2   : > { %v553_v19 = vpack.c.bf16 %v549_v18, %v549_v18  ;;  %607 = vst.msk [vmem:[#allocation3] sm:$0xf] %vm606_vm5, %v605_v51 }
  0xe4   : > { %555 = vst.msk [vmem:[#allocation2] sm:$0xf] %vm554_vm1, %v553_v19 }
  0xe7   : > { %v671_v20 = vpop.f32.mrf.mxu2  ;;  %v603_v52 = vpop.f32.mrf.mxu1 }
  0xe8   : > { %v675_v21 = vmul.f32 0.35355338, %v671_v20 }
  0xe9   : > { %v551_v22 = vpop.f32.mrf.mxu0  ;;  %v688_v53 = vld [vmem:[#allocation3] sm:$0xf] }
  0xea   : > { %v676_v23 = vpack.c.bf16 %v675_v21, %v675_v21  ;;  %v725_v54 = vsel %vm723_vm6, %v688_v53, 0  ;;  %v783_v55 = vunpack.c.l.b16 %v688_v53 }
  0xeb   : > { %v687_v24 = vld [vmem:[#allocation2] sm:$0xf] }
  0xec   : > { %v743_v25 = vunpack.c.l.b16 %v676_v23  ;;  %v694_v26 = vsel %vm689_vm2, %v687_v24, 0  ;;  %v748_v27 = vunpack.c.l.b16 %v687_v24  ;;  %v784_v56 = vpack.c.b16 %v783_v55, %v783_v55 }
  0xed   : > { %703 = vmatpush.bf16.xpose.msra.mxu3 %v694_v26 }
  0xee   : > { %v744_v28 = vpack.c.b16 %v743_v25, %v743_v25  ;;  %v749_v29 = vpack.c.b16 %v748_v27, %v748_v27 }
  0xef   : > { %v673_v30 = vpop.f32.mrf.mxu2 }
  0xf0   : > { %745 = vrot.lane.b32.xlu1 %v744_v28, %s1704_s30  ;;  %867 = vrot.lane.b32.xlu2 %v749_v29, %s1705_s9 }
  0xf1   : > { %750 = vrot.lane.b32.xlu0 %v749_v29, %s1704_s30 }
  0xf4   : > { %1225 = vmatmul.msk.bf16.vlgmr.msra.gmra.mxu3 %vm689_vm2, %v676_v23 }
  0xf5   : > { %734 = vmatpush.bf16.msrb.mxu3 %v725_v54 }
  0xf8   : > { %808 = vrot.lane.b32.xlu1 %v744_v28, %s1706_s5  ;;  %865 = vrot.lane.b32.xlu2 %v744_v28, %s1705_s9 }
  0xf9   : > { %810 = vrot.lane.b32.xlu0 %v749_v29, %s1706_s5 }
 0x123   : > { %681 = vadd.xlane.f32.xlu0 %v680_v37 }
 0x137   : > { %785 = vrot.lane.b32.xlu0 %v784_v56, %s1707_s4 }
 0x14a   : > { %v868_v38 = vpop.permute.xlu2 %867 }
 0x14b   : > { %v873_v41 = vsel %vm689_vm2, %v868_v38, 0 }
 0x152   : > { %v866_v48 = vpop.permute.xlu2 %865 }
 0x162   : > { %v746_v42 = vpop.permute.xlu1 %745 }
 0x163   : > { %v751_v39 = vpop.permute.xlu0 %750 }
 0x164   : > { %v756_v40 = vsel %vm689_vm2, %v751_v39, 0 }
 0x165   : > { %765 = vmatpush.bf16.xpose.msrb.mxu1 %v756_v40 }
 0x16a   : > { %v809_v45 = vpop.permute.xlu1 %808 }
 0x16b   : > { %v811_v43 = vpop.permute.xlu0 %810 }
 0x16c   : > { %1227 = vmatmul.msk.bf16.vlgmr.msrb.gmra.mxu1 %vm689_vm2, %v746_v42  ;;  %v816_v44 = vsel %vm689_vm2, %v811_v43, 0 }
 0x16d   : > { %882 = vmatpush.bf16.xpose.msra.mxu1 %v873_v41  ;;  %825 = vmatpush.bf16.xpose.msrb.mxu2 %v816_v44 }
 0x174   : > { %1229 = vmatmul.msk.bf16.vlgmr.msrb.gmra.mxu2 %vm689_vm2, %v809_v45 }
 0x177   : > { %v705_v46 = vpop.f32.mrf.mxu3 }
 0x178   : > { %v709_v47 = vsel %vm679_vm4, %v705_v46, -inf }
 0x179   : > { %710 = vmax.xlane.f32.xlu1 %v709_v47 }
 0x17c   : > { %1231 = vmatmul.msk.bf16.vlgmr.msra.gmra.mxu1 %vm689_vm2, %v866_v48 }
 0x17f   : > { %v707_v49 = vpop.f32.mrf.mxu3 }
 0x196   : > { %v682_v57 = vpop.xlane.xlu0 %681 }
 0x197   : > { %v683_v58 = vmul.f32 4.0, %v682_v57 }
 0x199   : > { %v684_v59 = vmax.f32 %v683_v58, 1e-30 }
 0x19b   : > { %1371 = vrcp.f32 %v684_v59 }
 0x1a1   : > { %v1372_v1 = vpop.eup %1371 }
 0x1a2   : > { %v686_v3 = vmul.f32 %v1372_v1, %v678_v36 }
 0x1a9   : > { %v786_v13 = vpop.permute.xlu0 %785 }
 0x1aa   : > { %v791_v14 = vsel %vm723_vm6, %v786_v13, 0 }
 0x1ab   : > { %800 = vmatpush.bf16.msrb.mxu0 %v791_v14 }
 0x1e9   : > { %v767_v60 = vpop.f32.mrf.mxu1 }
 0x1ea   : > { %v771_v61 = vsel %vm679_vm4, %v767_v60, -inf }
 0x1eb   : > { %772 = vmax.xlane.f32.xlu2 %v771_v61 }
 0x1ec   : > { %v711_v62 = vpop.xlane.xlu1 %710 }
 0x1ed   : > { %v712_v63 = vsub.f32 %v705_v46, %v711_v62 }
 0x1ef   : > { %v713_v0 = vmul.f32 1.442695, %v712_v63 }
 0x1f1   : > { %1373 = vpow2.f32 %v713_v0  ;;  %v769_v2 = vpop.f32.mrf.mxu1 }
 0x1f7   : > { %v1374_v4 = vpop.eup %1373  ;;  %v827_v5 = vpop.f32.mrf.mxu2 }
 0x1f8   : > { %v831_v6 = vsel %vm679_vm4, %v827_v5, -inf  ;;  %v718_v7 = vmul.f32 %v1374_v4, %v686_v3  ;;  %v715_v28 = vsel %vm679_vm4, %v1374_v4, 0.0 }
 0x1f9   : > { %v884_v8 = vpop.f32.mrf.mxu1  ;;  %832 = vmax.xlane.f32.xlu2 %v831_v6 }
 0x1fa   : > { %v888_v9 = vsel %vm679_vm4, %v884_v8, -inf  ;;  %v719_v10 = vpack.c.bf16 %v718_v7, %v718_v7 }
 0x1fb   : > { %889 = vmax.xlane.f32.xlu1 %v888_v9 }
 0x1fc   : > { %1226 = vmatmul.msk.bf16.vlgmr.msrb.gmra.mxu3 %vm679_vm4, %v719_v10 }
 0x1ff   : > { %v829_v11 = vpop.f32.mrf.mxu2 }
 0x201   : > { %v886_v12 = vpop.f32.mrf.mxu1 }
 0x211   : > { %842 = vrot.lane.b32.xlu2 %v784_v56, %s1708_s11 }
 0x214   : > { %899 = vrot.lane.b32.xlu1 %v784_v56, %s1706_s5 }
 0x25e   : > { %v773_v15 = vpop.xlane.xlu2 %772 }
 0x25f   : > { %v774_v16 = vsub.f32 %v767_v60, %v773_v15 }
 0x261   : > { %v775_v17 = vmul.f32 1.442695, %v774_v16 }
 0x263   : > { %1375 = vpow2.f32 %v775_v17 }
 0x269   : > { %v1376_v18 = vpop.eup %1375 }
 0x26a   : > { %v777_v19 = vsel %vm679_vm4, %v1376_v18, 0.0  ;;  %v780_v20 = vmul.f32 %v1376_v18, %v686_v3 }
 0x26b   : > { %778 = vadd.xlane.f32.xlu0 %v777_v19 }
 0x26c   : > { %v833_v21 = vpop.xlane.xlu2 %832  ;;  %v781_v22 = vpack.c.bf16 %v780_v20, %v780_v20 }
 0x26d   : > { %v834_v23 = vsub.f32 %v827_v5, %v833_v21 }
 0x26e   : > { %1228 = vmatmul.msk.bf16.vlgmr.msrb.gmra.mxu0 %vm679_vm4, %v781_v22  ;;  %v890_v24 = vpop.xlane.xlu1 %889 }
 0x26f   : > { %v835_v25 = vmul.f32 1.442695, %v834_v23  ;;  %v891_v26 = vsub.f32 %v884_v8, %v890_v24 }
 0x271   : > { %1377 = vpow2.f32 %v835_v25  ;;  %v892_v27 = vmul.f32 1.442695, %v891_v26 }
 0x273   : > { %1379 = vpow2.f32 %v892_v27  ;;  %716 = vadd.xlane.f32.xlu0 %v715_v28 }
 0x274   : > { %v843_v29 = vpop.permute.xlu2 %842 }
 0x275   : > { %v848_v30 = vsel %vm723_vm6, %v843_v29, 0 }
 0x276   : > { %857 = vmatpush.bf16.msra.mxu3 %v848_v30 }
 0x277   : > { %v1378_v31 = vpop.eup %1377 }
 0x278   : > { %v840_v32 = vmul.f32 %v1378_v31, %v686_v3  ;;  %v837_v33 = vsel %vm679_vm4, %v1378_v31, 0.0 }
 0x279   : > { %v1380_v34 = vpop.eup %1379  ;;  %838 = vadd.xlane.f32.xlu2 %v837_v33 }
 0x27a   : > { %v841_v35 = vpack.c.bf16 %v840_v32, %v840_v32  ;;  %v894_v36 = vsel %vm679_vm4, %v1380_v34, 0.0  ;;  %v897_v38 = vmul.f32 %v1380_v34, %v686_v3 }
 0x27b   : > { %895 = vadd.xlane.f32.xlu1 %v894_v36 }
 0x27c   : > { %1230 = vmatmul.msk.bf16.vlgmr.msra.gmra.mxu3 %vm679_vm4, %v841_v35  ;;  %v898_v42 = vpack.c.bf16 %v897_v38, %v897_v38 }
 0x27f   : > { %v736_v37 = vpop.f32.mrf.mxu3 }
 0x286   : > { %v900_v39 = vpop.permute.xlu1 %899 }
 0x287   : > { %v905_v40 = vsel %vm723_vm6, %v900_v39, 0  ;;  %v738_v41 = vpop.f32.mrf.mxu3 }
 0x288   : > { %914 = vmatpush.bf16.msra.mxu0 %v905_v40 }
 0x28b   : > { %1232 = vmatmul.msk.bf16.vlgmr.msra.gmra.mxu0 %vm679_vm4, %v898_v42 }
 0x2de   : > { %v779_v43 = vpop.xlane.xlu0 %778 }
 0x2df   : > { %1381 = vrcp.f32 %v779_v43 }
 0x2e5   : > { %v1382_v44 = vpop.eup %1381 }
 0x2e6   : > { %v717_v58 = vpop.xlane.xlu0 %716 }
 0x2eb   : > { %v802_v45 = vpop.f32.mrf.mxu0 }
 0x2ec   : > { %v807_v46 = vmul.f32 %v1382_v44, %v802_v45  ;;  %v839_v48 = vpop.xlane.xlu2 %838 }
 0x2ed   : > { %1383 = vrcp.f32 %v839_v48 }
 0x2ee   : > { %923 = vrot.lane.b32.xlu0 %v807_v46, %s1709_s24  ;;  %v896_v50 = vpop.xlane.xlu1 %895 }
 0x2ef   : > { %1385 = vrcp.f32 %v896_v50 }
 0x2f0   : > { %1387 = vrcp.f32 %v717_v58 }
 0x2f3   : > { %v804_v47 = vpop.f32.mrf.mxu0  ;;  %v1384_v49 = vpop.eup %1383 }
 0x2f5   : > { %v1386_v54 = vpop.eup %1385 }
 0x2f6   : > { %v1388_v59 = vpop.eup %1387 }
 0x2f7   : > { %v741_v61 = vmul.f32 %v1388_v59, %v736_v37 }
 0x2ff   : > { %v859_v51 = vpop.f32.mrf.mxu3 }
 0x300   : > { %v864_v52 = vmul.f32 %v1384_v49, %v859_v51 }
 0x302   : > { %927 = vrot.lane.b32.xlu2 %v864_v52, %s1710_s8 }
 0x307   : > { %v861_v53 = vpop.f32.mrf.mxu3 }
 0x308   : > { %v916_v55 = vpop.f32.mrf.mxu0 }
 0x309   : > { %v921_v56 = vmul.f32 %v1386_v54, %v916_v55 }
 0x30b   : > { %931 = vrot.lane.b32.xlu1 %v921_v56, %s1711_s15 }
 0x310   : > { %v918_v57 = vpop.f32.mrf.mxu0 }
 0x35c   : > { %v928_v63 = vpop.permute.xlu2 %927 }
 0x360   : > { %v924_v60 = vpop.permute.xlu0 %923 }
 0x361   : > { %v935_v62 = vsel %vm934_vm7, %v741_v61, %v924_v60 }
 0x362   : > { %v937_v0 = vsel %vm936_vm8, %v935_v62, %v928_v63 }
 0x37d   : > { %v932_v1 = vpop.permute.xlu1 %931 }
 0x37e   : > { %v939_v2 = vsel %vm938_vm9, %v937_v0, %v932_v1 }
 0x37f   : > { %941 = vst.msk [vmem:[%s478_s18] sm:$0xff] %vm588_vm3, %v939_v2 }
 0x380   : > { %1626 = shalt.err (!%p1623_p12)
}
 0x381   : > { %1273 = dma.vmem_to_hbm [thread:$0]  (%p1841_p7), %s957_s14, 128, %s959_s20, %s943_s27  }
 0x382 PF: > { %s2049_s6 = sld [smem:[#allocation23_spill]]  ;;  %p2051_p13 = scmp.ge.s32.totalorder %s1697_s29, 2 }
 0x384   : > { %p1299_p0 = pnand %p2051_p13, %p1797_p6 }
 0x386   : > { %p1300_p3 = pneg %p1299_p0 }
 0x388   : > { %s970_s5 = sand.u32 1, %s2049_s6  }
 0x389   : > { %s971_s4 = scalar_lea.sflag [#allocation6], %s970_s5 }
 0x38a   : > { %1672 = dma.done.wait (%p1300_p3), %s971_s4, 128  }
 0x38b   : > { %1674 = vsyncadd (%p1300_p3), %s971_s4, 4294967168  ;;  %s30_s29 = sadd.s32 1, %s1697_s29   ;;  %s2052_s11 = sld [smem:[#allocation24_spill]] }
 0x38c   : > { %p27_p5 = scmp.ge.s32.totalorder %s30_s29, 4   ;;  %s2053_s26 = sld [smem:[#allocation27_spill]] }
 0x38d   : > { %s2054_s13 = sld [smem:[#allocation26_spill]]  ;;  %s2055_s24 = smov %s1681_s25 }
 0x38e   : > { %s2057_s27 = smov %s1693_s28 }
 0x38f   :  { %29 = sbr.rel (!%p27_p5) target bundleno = 16 (0x10), region = 146 }
 0x391   : > { %s2056_s25 = smov %s2052_s11 }
 0x393   : > { %s2058_s28 = smov %s2054_s13 }
 0x394   :  { %977 = vsyncpa [#allocation5], 1 }
 0x395   :  { %979 = vsyncpa [#allocation5 + $0x1], 1 }
 0x396   :  { %980 = vsyncpa [#allocation8], 1 }
 0x397   :  { %982 = vsyncpa [#allocation8 + $0x1], 1 }
 0x398   :  { %983 = vsyncpa [#allocation11], 1 }
 0x399   :  { %985 = vsyncpa [#allocation11 + $0x1], 1 }
 0x39a   :  { %986 = vsyncpa [#allocation14], 1 }
 0x39b   :  { %987 = vsyncpa [#allocation6], 1 }
 0x39c   :  { %989 = vsyncpa [#allocation6 + $0x1], 1 }

</bundles_post_ra>
